<compile_context>
chip_gen: v7x
topology: tpu7x:2x2x1
jax: 0.10.0
libtpu: 0.0.40
codegen_flags: <defaults>
</compile_context>

<pallas_src>
import functools

import jax
import jax.numpy as jnp
from jax import lax
from jax.experimental import pallas as pl
from jax.experimental.pallas import tpu as pltpu


def _rowsum8(v):
    """(rows, 128) f32 -> (8, 128) partial whose total equals v.sum().

    Multiple-of-8 rows: pure vreg tree-add (VPU only).  Ragged tails: one
    sublane reduce placed into sublane 0.
    """
    rows, lanes = v.shape
    if rows % 8 == 0:
        acc = v[0:8]
        for k in range(1, rows // 8):
            acc = acc + v[8 * k:8 * (k + 1)]
        return acc
    s = jnp.sum(v, axis=0, keepdims=True)                      # (1, lanes)
    rid = lax.broadcasted_iota(jnp.int32, (8, lanes), 0)
    return jnp.where(rid == 0, s, 0.0)


def _wdice_kernel(logits_ref, target_ref, out_ref, *,
                  n_classes, tsub, last_rows, chunk, exp_dtype):
    # logits_ref: (1, C, tsub, 128) native dtype
    # target_ref: (1, tsub, 128) int32
    # out_ref:    (1, 3, C, 8, 128) f32 — resident accumulator across the
    #             L-tile axis holding [intersection, pred-sum, target-sum]
    #             vreg-shaped partial sums per class.
    C = n_classes
    j = pl.program_id(1)

    @pl.when(j == 0)
    def _init():
        out_ref[...] = jnp.zeros_like(out_ref)

    def partials(row, rows, carry):
        """Add partial sums for `rows` sublane-rows starting at `row`."""
        inter, psum, tsum = carry
        t = target_ref[0, pl.ds(row, rows), :]                  # (rows, 128) int32
        xs = [logits_ref[0, c, pl.ds(row, rows), :].astype(exp_dtype)
              for c in range(C)]
        m = xs[0]
        for c in range(1, C):
            m = jnp.maximum(m, xs[c])
        # exp in bf16 for bf16 inputs (EUP bf16 path), upcast for accumulation.
        es = [jnp.exp(xs[c] - m).astype(jnp.float32) for c in range(C)]
        denom = es[0]
        for c in range(1, C):
            denom = denom + es[c]
        inv = 1.0 / denom                                       # exact recip / pixel
        new_inter, new_psum, new_tsum = [], [], []
        for c in range(C):
            p = es[c] * inv
            hot = t == c                                        # bool one-hot
            new_inter.append(inter[c] + _rowsum8(jnp.where(hot, p, 0.0)))
            new_psum.append(psum[c] + _rowsum8(p))
            new_tsum.append(tsum[c] + _rowsum8(hot.astype(jnp.float32)))
        return tuple(new_inter), tuple(new_psum), tuple(new_tsum)

    def process(rows):
        # Load current accumulators into registers, walk the tile in chunks,
        # write accumulators back once per tile.
        carry = tuple(tuple(out_ref[0, q, c] for c in range(C)) for q in range(3))
        num_full = rows // chunk
        rem = rows - num_full * chunk
        if num_full > 0:
            def body(k, carry):
                row = pl.multiple_of(k * chunk, chunk)
                return partials(row, chunk, carry)
            carry = lax.fori_loop(0, num_full, body, carry, unroll=2)
        if rem:
            carry = partials(num_full * chunk, rem, carry)
        for q in range(3):
            for c in range(C):
                out_ref[0, q, c] = carry[q][c]

    if last_rows == tsub:
        process(tsub)                       # uniform tiles: single static path
    else:
        nj = pl.num_programs(1)

        @pl.when(j < nj - 1)
        def _full_tile():
            process(tsub)

        @pl.when(j == nj - 1)
        def _ragged_tile():                 # last tile: only read the valid rows
            process(last_rows)


def cross_wdice_softmax_loss(logits_nchw, target_nhw, weight=None,
                             *, tile_budget_bytes=8 * 1024 * 1024):
    """JAX/Pallas equivalent of cross_wdice_softmax.forward(inputs, target)."""
    N, C, H, W = logits_nchw.shape
    L = H * W

    logits = logits_nchw.reshape(N, C, L)          # free view, no dtype copy
    target = target_nhw.reshape(N, L)
    if jnp.dtype(target.dtype) != jnp.dtype(jnp.int32):
        target = target.astype(jnp.int32)

    # Spatial axis viewed lane-dense as (nblk, 128).  Only when H*W is not a
    # multiple of 128 do we pad (zero logits, -1 labels); padded pixels'
    # softmax contribution (exactly pad/C per class) is removed analytically
    # below, so the kernel never does per-pixel masking.
    nblk = -(-L // 128)
    L_pad = nblk * 128
    pad = L_pad - L
    if pad:
        # TODO(synk): one extra HBM pass over logits, only when H*W % 128 != 0
        # (the lane-dense reshape needs a multiple of 128).
        logits = jnp.pad(logits, ((0, 0), (0, 0), (0, pad)))
        target = jnp.pad(target, ((0, 0), (0, pad)), constant_values=-1)
    logits = logits.reshape(N, C, nblk, 128)
    target = target.reshape(N, nblk, 128)

    # Large DMA tiles amortize the per-grid-step overhead; the in-kernel chunk
    # loop keeps register pressure independent of the DMA tile size.
    itemsize = jnp.dtype(logits.dtype).itemsize
    bytes_per_row = C * 128 * itemsize + 128 * 4       # logits + target per 128-px row
    cap = max(32, (int(tile_budget_bytes) // bytes_per_row) // 32 * 32)
    if cap >= nblk:
        tsub, num_tiles = nblk, 1                       # single tile (full dim)
    else:
        tsub = cap                                      # multiple of 32: legal packing
        num_tiles = -(-nblk // tsub)                    # ragged last tile handled in-kernel
    last_rows = nblk - (num_tiles - 1) * tsub

    exp_dtype = jnp.bfloat16 if logits.dtype == jnp.bfloat16 else jnp.float32
    kernel = functools.partial(_wdice_kernel, n_classes=C, tsub=tsub,
                               last_rows=last_rows, chunk=32, exp_dtype=exp_dtype)

    tile_bytes = tsub * bytes_per_row
    vmem_limit = int(min(64 << 20, max(32 << 20, 2 * tile_bytes + (8 << 20))))

    partial_sums = pl.pallas_call(
        kernel,
        out_shape=jax.ShapeDtypeStruct((N, 3, C, 8, 128), jnp.float32),
        grid_spec=pltpu.PrefetchScalarGridSpec(
            num_scalar_prefetch=0,
            grid=(N, num_tiles),
            in_specs=[
                pl.BlockSpec((1, C, tsub, 128), lambda n, j: (n, 0, j, 0)),
                pl.BlockSpec((1, tsub, 128), lambda n, j: (n, j, 0)),
            ],
            out_specs=pl.BlockSpec((1, 3, C, 8, 128),
                                   lambda n, j: (n, 0, 0, 0, 0))),
        compiler_params=pltpu.CompilerParams(
            dimension_semantics=("parallel", "arbitrary"),
            vmem_limit_bytes=vmem_limit),
        cost_estimate=pl.CostEstimate(
            flops=14 * N * C * L_pad,
            transcendentals=N * C * L_pad,
            bytes_accessed=N * C * L_pad * itemsize + N * L_pad * 4
                           + N * 3 * C * 8 * 128 * 4),
    )(logits, target)

    # Tiny epilogue in plain JAX: reduce the (8,128) partials, fix the padded
    # psum contribution, form dice and the weighted batch-mean.
    sums = jnp.sum(partial_sums, axis=(3, 4))           # (N, 3, C)
    inter = sums[:, 0]
    psum = sums[:, 1]
    tsum = sums[:, 2]
    if pad:
        psum = psum - pad / C                            # zero-logit pixels add 1/C each
    smooth = 1e-9
    dice = (2.0 * inter + smooth) / (psum + tsum + smooth)   # (N, C)
    one_minus_dice = 1.0 - dice
    if weight is None:
        w = jnp.ones((C,), jnp.float32)
    else:
        w = jnp.asarray(weight, dtype=jnp.float32).reshape(C)
    wdice = jnp.mean(one_minus_dice, axis=0)             # mean over batch per class
    # NOTE: divide by n_classes (not sum(weight)) — matches the PyTorch module.
    return jnp.sum(wdice * w) / C


def _reference_loss(logits_nchw, target_nhw, weight=None):
    # Pure-JAX reference mirroring the PyTorch module.
    N, C, H, W = logits_nchw.shape
    p = jax.nn.softmax(logits_nchw.astype(jnp.float32), axis=1)
    onehot = (target_nhw[:, None, :, :] ==
              jnp.arange(C, dtype=target_nhw.dtype)[None, :, None, None]
              ).astype(jnp.float32)
    if weight is None:
        weight = [1.0] * C
    smooth = 1e-9
    loss = 0.0
    for i in range(C):
        inputs = p[:, i].reshape(N, -1)
        targets = onehot[:, i].reshape(N, -1)
        inter = jnp.sum(inputs * targets, axis=1)
        dice = (2.0 * inter + smooth) / (jnp.sum(inputs, axis=1) +
                                         jnp.sum(targets, axis=1) + smooth)
        loss = loss + jnp.mean(1.0 - dice) * weight[i]
    return loss / C


if __name__ == "__main__":
    key = jax.random.PRNGKey(0)
    k1, k2, k3, k4, k5, k6 = jax.random.split(key, 6)

    # Primary configuration: N=2, C=4, 16x16 spatial (L = 256 = 2 * 128).
    N, C, H, W = 2, 4, 16, 16
    logits = jax.random.normal(k1, (N, C, H, W), dtype=jnp.float32)
    target = jax.random.randint(k2, (N, H, W), 0, C, dtype=jnp.int32)

    loss = jax.block_until_ready(cross_wdice_softmax_loss(logits, target))
    ref = jax.block_until_ready(_reference_loss(logits, target))
    assert jnp.allclose(loss, ref, rtol=1e-5, atol=1e-6), (loss, ref)

    # Non-uniform class weights.
    wvec = jnp.array([0.5, 1.0, 2.0, 1.5], dtype=jnp.float32)
    loss_w = jax.block_until_ready(cross_wdice_softmax_loss(logits, target, wvec))
    ref_w = jax.block_until_ready(_reference_loss(logits, target, wvec))
    assert jnp.allclose(loss_w, ref_w, rtol=1e-5, atol=1e-6), (loss_w, ref_w)

    # Spatial size not a multiple of 128 -> padded path + analytic psum fix.
    H2, W2 = 10, 10
    logits2 = jax.random.normal(k3, (N, C, H2, W2), dtype=jnp.float32)
    target2 = jax.random.randint(k4, (N, H2, W2), 0, C, dtype=jnp.int32)
    loss2 = jax.block_until_ready(cross_wdice_softmax_loss(logits2, target2))
    ref2 = jax.block_until_ready(_reference_loss(logits2, target2))
    assert jnp.allclose(loss2, ref2, rtol=1e-5, atol=1e-6), (loss2, ref2)

    # Multi-tile path: a small tile budget forces grid tiling with a ragged
    # last tile, exercising the chunk loop, remainder handling and the
    # cross-tile accumulation (L = 5184 -> 41 rows of 128, tiles of 32 rows).
    H3, W3 = 72, 72
    logits3 = jax.random.normal(k5, (N, C, H3, W3), dtype=jnp.float32)
    target3 = jax.random.randint(k6, (N, H3, W3), 0, C, dtype=jnp.int32)
    loss3 = jax.block_until_ready(
        cross_wdice_softmax_loss(logits3, target3, tile_budget_bytes=64 * 1024))
    ref3 = jax.block_until_ready(_reference_loss(logits3, target3))
    assert jnp.allclose(loss3, ref3, rtol=1e-5, atol=1e-6), (loss3, ref3)

    print("KERNEL_OK")
</pallas_src>

<mosaic_0001>
module attributes {stable_mosaic.version = 11 : i64} {
  func.func @_wdice_kernel(%arg0: i32, %arg1: i32, %arg2: memref<1x4x2x128xf32, #tpu.memory_space<vmem>>, %arg3: memref<1x2x128xi32, #tpu.memory_space<vmem>>, %arg4: memref<1x3x4x8x128xf32, #tpu.memory_space<vmem>>) attributes {dimension_semantics = [#tpu.dimension_semantics<parallel>, #tpu.dimension_semantics<arbitrary>], iteration_bounds = array<i64: 2, 1>, scalar_prefetch = 0 : i64, scratch_operands = 0 : i64, tpu.core_type = #tpu.core_type<tc>, window_params = [{transform_indices = @transform_0, window_bounds = array<i64: 1, 4, 2, 128>}, {transform_indices = @transform_1, window_bounds = array<i64: 1, 2, 128>}, {transform_indices = @transform_2, window_bounds = array<i64: 1, 3, 4, 8, 128>}]} {
    %c0_i32 = arith.constant 0 : i32
    %0 = arith.cmpi eq, %arg1, %c0_i32 : i32
    %1 = arith.extui %0 : i1 to i32
    %c0_i32_0 = arith.constant 0 : i32
    %2 = arith.cmpi ne, %1, %c0_i32_0 : i32
    scf.if %2 {
      %cst_177 = arith.constant 0.000000e+00 : f32
      %237 = vector.broadcast %cst_177 : f32 to vector<1x3x4x8x128xf32>
      %c0_178 = arith.constant 0 : index
      %c0_179 = arith.constant 0 : index
      %c0_180 = arith.constant 0 : index
      %c0_181 = arith.constant 0 : index
      %c0_182 = arith.constant 0 : index
      %238 = vector.load %arg4[%c0_178, %c0_179, %c0_180, %c0_181, %c0_182] : memref<1x3x4x8x128xf32, #tpu.memory_space<vmem>>, vector<1x3x4x8x128xf32>
      tpu.vector_store %arg4[%c0_178, %c0_179, %c0_180, %c0_181, %c0_182], %237 {strides = array<i32>} : memref<1x3x4x8x128xf32, #tpu.memory_space<vmem>>, vector<1x3x4x8x128xf32>,
    } else {
    }
    %c0 = arith.constant 0 : index
    %c0_1 = arith.constant 0 : index
    %c0_2 = arith.constant 0 : index
    %c0_3 = arith.constant 0 : index
    %c0_4 = arith.constant 0 : index
    %3 = vector.load %arg4[%c0, %c0_1, %c0_2, %c0_3, %c0_4] : memref<1x3x4x8x128xf32, #tpu.memory_space<vmem>>, vector<1x1x1x8x128xf32>
    %4 = vector.shape_cast %3 : vector<1x1x1x8x128xf32> to vector<8x128xf32>
    %c0_5 = arith.constant 0 : index
    %c0_6 = arith.constant 0 : index
    %c1 = arith.constant 1 : index
    %c0_7 = arith.constant 0 : index
    %c0_8 = arith.constant 0 : index
    %5 = vector.load %arg4[%c0_5, %c0_6, %c1, %c0_7, %c0_8] : memref<1x3x4x8x128xf32, #tpu.memory_space<vmem>>, vector<1x1x1x8x128xf32>
    %6 = vector.shape_cast %5 : vector<1x1x1x8x128xf32> to vector<8x128xf32>
    %c0_9 = arith.constant 0 : index
    %c0_10 = arith.constant 0 : index
    %c2 = arith.constant 2 : index
    %c0_11 = arith.constant 0 : index
    %c0_12 = arith.constant 0 : index
    %7 = vector.load %arg4[%c0_9, %c0_10, %c2, %c0_11, %c0_12] : memref<1x3x4x8x128xf32, #tpu.memory_space<vmem>>, vector<1x1x1x8x128xf32>
    %8 = vector.shape_cast %7 : vector<1x1x1x8x128xf32> to vector<8x128xf32>
    %c0_13 = arith.constant 0 : index
    %c0_14 = arith.constant 0 : index
    %c3 = arith.constant 3 : index
    %c0_15 = arith.constant 0 : index
    %c0_16 = arith.constant 0 : index
    %9 = vector.load %arg4[%c0_13, %c0_14, %c3, %c0_15, %c0_16] : memref<1x3x4x8x128xf32, #tpu.memory_space<vmem>>, vector<1x1x1x8x128xf32>
    %10 = vector.shape_cast %9 : vector<1x1x1x8x128xf32> to vector<8x128xf32>
    %c0_17 = arith.constant 0 : index
    %c1_18 = arith.constant 1 : index
    %c0_19 = arith.constant 0 : index
    %c0_20 = arith.constant 0 : index
    %c0_21 = arith.constant 0 : index
    %11 = vector.load %arg4[%c0_17, %c1_18, %c0_19, %c0_20, %c0_21] : memref<1x3x4x8x128xf32, #tpu.memory_space<vmem>>, vector<1x1x1x8x128xf32>
    %12 = vector.shape_cast %11 : vector<1x1x1x8x128xf32> to vector<8x128xf32>
    %c0_22 = arith.constant 0 : index
    %c1_23 = arith.constant 1 : index
    %c1_24 = arith.constant 1 : index
    %c0_25 = arith.constant 0 : index
    %c0_26 = arith.constant 0 : index
    %13 = vector.load %arg4[%c0_22, %c1_23, %c1_24, %c0_25, %c0_26] : memref<1x3x4x8x128xf32, #tpu.memory_space<vmem>>, vector<1x1x1x8x128xf32>
    %14 = vector.shape_cast %13 : vector<1x1x1x8x128xf32> to vector<8x128xf32>
    %c0_27 = arith.constant 0 : index
    %c1_28 = arith.constant 1 : index
    %c2_29 = arith.constant 2 : index
    %c0_30 = arith.constant 0 : index
    %c0_31 = arith.constant 0 : index
    %15 = vector.load %arg4[%c0_27, %c1_28, %c2_29, %c0_30, %c0_31] : memref<1x3x4x8x128xf32, #tpu.memory_space<vmem>>, vector<1x1x1x8x128xf32>
    %16 = vector.shape_cast %15 : vector<1x1x1x8x128xf32> to vector<8x128xf32>
    %c0_32 = arith.constant 0 : index
    %c1_33 = arith.constant 1 : index
    %c3_34 = arith.constant 3 : index
    %c0_35 = arith.constant 0 : index
    %c0_36 = arith.constant 0 : index
    %17 = vector.load %arg4[%c0_32, %c1_33, %c3_34, %c0_35, %c0_36] : memref<1x3x4x8x128xf32, #tpu.memory_space<vmem>>, vector<1x1x1x8x128xf32>
    %18 = vector.shape_cast %17 : vector<1x1x1x8x128xf32> to vector<8x128xf32>
    %c0_37 = arith.constant 0 : index
    %c2_38 = arith.constant 2 : index
    %c0_39 = arith.constant 0 : index
    %c0_40 = arith.constant 0 : index
    %c0_41 = arith.constant 0 : index
    %19 = vector.load %arg4[%c0_37, %c2_38, %c0_39, %c0_40, %c0_41] : memref<1x3x4x8x128xf32, #tpu.memory_space<vmem>>, vector<1x1x1x8x128xf32>
    %20 = vector.shape_cast %19 : vector<1x1x1x8x128xf32> to vector<8x128xf32>
    %c0_42 = arith.constant 0 : index
    %c2_43 = arith.constant 2 : index
    %c1_44 = arith.constant 1 : index
    %c0_45 = arith.constant 0 : index
    %c0_46 = arith.constant 0 : index
    %21 = vector.load %arg4[%c0_42, %c2_43, %c1_44, %c0_45, %c0_46] : memref<1x3x4x8x128xf32, #tpu.memory_space<vmem>>, vector<1x1x1x8x128xf32>
    %22 = vector.shape_cast %21 : vector<1x1x1x8x128xf32> to vector<8x128xf32>
    %c0_47 = arith.constant 0 : index
    %c2_48 = arith.constant 2 : index
    %c2_49 = arith.constant 2 : index
    %c0_50 = arith.constant 0 : index
    %c0_51 = arith.constant 0 : index
    %23 = vector.load %arg4[%c0_47, %c2_48, %c2_49, %c0_50, %c0_51] : memref<1x3x4x8x128xf32, #tpu.memory_space<vmem>>, vector<1x1x1x8x128xf32>
    %24 = vector.shape_cast %23 : vector<1x1x1x8x128xf32> to vector<8x128xf32>
    %c0_52 = arith.constant 0 : index
    %c2_53 = arith.constant 2 : index
    %c3_54 = arith.constant 3 : index
    %c0_55 = arith.constant 0 : index
    %c0_56 = arith.constant 0 : index
    %25 = vector.load %arg4[%c0_52, %c2_53, %c3_54, %c0_55, %c0_56] : memref<1x3x4x8x128xf32, #tpu.memory_space<vmem>>, vector<1x1x1x8x128xf32>
    %26 = vector.shape_cast %25 : vector<1x1x1x8x128xf32> to vector<8x128xf32>
    %c0_57 = arith.constant 0 : index
    %c0_58 = arith.constant 0 : index
    %c0_59 = arith.constant 0 : index
    %27 = vector.load %arg3[%c0_57, %c0_58, %c0_59] : memref<1x2x128xi32, #tpu.memory_space<vmem>>, vector<1x2x128xi32>
    %28 = vector.shape_cast %27 : vector<1x2x128xi32> to vector<2x128xi32>
    %c0_60 = arith.constant 0 : index
    %c0_61 = arith.constant 0 : index
    %c0_62 = arith.constant 0 : index
    %c0_63 = arith.constant 0 : index
    %29 = vector.load %arg2[%c0_60, %c0_61, %c0_62, %c0_63] : memref<1x4x2x128xf32, #tpu.memory_space<vmem>>, vector<1x1x2x128xf32>
    %30 = vector.shape_cast %29 : vector<1x1x2x128xf32> to vector<2x128xf32>
    %c0_64 = arith.constant 0 : index
    %c1_65 = arith.constant 1 : index
    %c0_66 = arith.constant 0 : index
    %c0_67 = arith.constant 0 : index
    %31 = vector.load %arg2[%c0_64, %c1_65, %c0_66, %c0_67] : memref<1x4x2x128xf32, #tpu.memory_space<vmem>>, vector<1x1x2x128xf32>
    %32 = vector.shape_cast %31 : vector<1x1x2x128xf32> to vector<2x128xf32>
    %c0_68 = arith.constant 0 : index
    %c2_69 = arith.constant 2 : index
    %c0_70 = arith.constant 0 : index
    %c0_71 = arith.constant 0 : index
    %33 = vector.load %arg2[%c0_68, %c2_69, %c0_70, %c0_71] : memref<1x4x2x128xf32, #tpu.memory_space<vmem>>, vector<1x1x2x128xf32>
    %34 = vector.shape_cast %33 : vector<1x1x2x128xf32> to vector<2x128xf32>
    %c0_72 = arith.constant 0 : index
    %c3_73 = arith.constant 3 : index
    %c0_74 = arith.constant 0 : index
    %c0_75 = arith.constant 0 : index
    %35 = vector.load %arg2[%c0_72, %c3_73, %c0_74, %c0_75] : memref<1x4x2x128xf32, #tpu.memory_space<vmem>>, vector<1x1x2x128xf32>
    %36 = vector.shape_cast %35 : vector<1x1x2x128xf32> to vector<2x128xf32>
    %37 = arith.maximumf %30, %32 : vector<2x128xf32>
    %38 = arith.maximumf %37, %34 : vector<2x128xf32>
    %39 = arith.maximumf %38, %36 : vector<2x128xf32>
    %40 = arith.subf %30, %39 : vector<2x128xf32>
    %41 = math.exp %40 : vector<2x128xf32>
    %42 = arith.subf %32, %39 : vector<2x128xf32>
    %43 = math.exp %42 : vector<2x128xf32>
    %44 = arith.subf %34, %39 : vector<2x128xf32>
    %45 = math.exp %44 : vector<2x128xf32>
    %46 = arith.subf %36, %39 : vector<2x128xf32>
    %47 = math.exp %46 : vector<2x128xf32>
    %48 = arith.addf %41, %43 : vector<2x128xf32>
    %49 = arith.addf %48, %45 : vector<2x128xf32>
    %50 = arith.addf %49, %47 : vector<2x128xf32>
    %cst = arith.constant 1.000000e+00 : f32
    %51 = vector.broadcast %cst : f32 to vector<2x128xf32>
    %52 = arith.divf %51, %50 : vector<2x128xf32>
    %53 = arith.mulf %41, %52 : vector<2x128xf32>
    %c0_i32_76 = arith.constant 0 : i32
    %54 = vector.broadcast %c0_i32_76 : i32 to vector<2x128xi32>
    %55 = arith.cmpi eq, %28, %54 : vector<2x128xi32>
    %cst_77 = arith.constant 0.000000e+00 : f32
    %56 = vector.broadcast %cst_77 : f32 to vector<2x128xf32>
    %57 = arith.select %55, %53, %56 : vector<2x128xi1>, vector<2x128xf32>
    %cst_78 = arith.constant dense<0.000000e+00> : vector<128xf32>
    %58 = vector.multi_reduction <add>, %57, %cst_78 [0] : vector<2x128xf32> to vector<128xf32>
    %59 = vector.shape_cast %58 : vector<128xf32> to vector<1x128xf32>
    %60 = tpu.iota {dimensions = array<i32: 0>} : vector<8x128xi32>
    %c0_i32_79 = arith.constant 0 : i32
    %61 = vector.broadcast %c0_i32_79 : i32 to vector<8x128xi32>
    %62 = arith.cmpi eq, %60, %61 : vector<8x128xi32>
    %cst_80 = arith.constant 0.000000e+00 : f32
    %63 = vector.shape_cast %59 : vector<1x128xf32> to vector<1x128xf32>
    %64 = vector.broadcast %63 : vector<1x128xf32> to vector<8x128xf32>
    %65 = vector.broadcast %cst_80 : f32 to vector<8x128xf32>
    %66 = arith.select %62, %64, %65 : vector<8x128xi1>, vector<8x128xf32>
    %67 = arith.addf %4, %66 : vector<8x128xf32>
    %cst_81 = arith.constant dense<0.000000e+00> : vector<128xf32>
    %68 = vector.multi_reduction <add>, %53, %cst_81 [0] : vector<2x128xf32> to vector<128xf32>
    %69 = vector.shape_cast %68 : vector<128xf32> to vector<1x128xf32>
    %70 = tpu.iota {dimensions = array<i32: 0>} : vector<8x128xi32>
    %c0_i32_82 = arith.constant 0 : i32
    %71 = vector.broadcast %c0_i32_82 : i32 to vector<8x128xi32>
    %72 = arith.cmpi eq, %70, %71 : vector<8x128xi32>
    %cst_83 = arith.constant 0.000000e+00 : f32
    %73 = vector.shape_cast %69 : vector<1x128xf32> to vector<1x128xf32>
    %74 = vector.broadcast %73 : vector<1x128xf32> to vector<8x128xf32>
    %75 = vector.broadcast %cst_83 : f32 to vector<8x128xf32>
    %76 = arith.select %72, %74, %75 : vector<8x128xi1>, vector<8x128xf32>
    %77 = arith.addf %12, %76 : vector<8x128xf32>
    %78 = arith.extui %55 : vector<2x128xi1> to vector<2x128xi32>
    %79 = arith.sitofp %78 : vector<2x128xi32> to vector<2x128xf32>
    %cst_84 = arith.constant dense<0.000000e+00> : vector<128xf32>
    %80 = vector.multi_reduction <add>, %79, %cst_84 [0] : vector<2x128xf32> to vector<128xf32>
    %81 = vector.shape_cast %80 : vector<128xf32> to vector<1x128xf32>
    %82 = tpu.iota {dimensions = array<i32: 0>} : vector<8x128xi32>
    %c0_i32_85 = arith.constant 0 : i32
    %83 = vector.broadcast %c0_i32_85 : i32 to vector<8x128xi32>
    %84 = arith.cmpi eq, %82, %83 : vector<8x128xi32>
    %cst_86 = arith.constant 0.000000e+00 : f32
    %85 = vector.shape_cast %81 : vector<1x128xf32> to vector<1x128xf32>
    %86 = vector.broadcast %85 : vector<1x128xf32> to vector<8x128xf32>
    %87 = vector.broadcast %cst_86 : f32 to vector<8x128xf32>
    %88 = arith.select %84, %86, %87 : vector<8x128xi1>, vector<8x128xf32>
    %89 = arith.addf %20, %88 : vector<8x128xf32>
    %90 = arith.mulf %43, %52 : vector<2x128xf32>
    %c1_i32 = arith.constant 1 : i32
    %91 = vector.broadcast %c1_i32 : i32 to vector<2x128xi32>
    %92 = arith.cmpi eq, %28, %91 : vector<2x128xi32>
    %cst_87 = arith.constant 0.000000e+00 : f32
    %93 = vector.broadcast %cst_87 : f32 to vector<2x128xf32>
    %94 = arith.select %92, %90, %93 : vector<2x128xi1>, vector<2x128xf32>
    %cst_88 = arith.constant dense<0.000000e+00> : vector<128xf32>
    %95 = vector.multi_reduction <add>, %94, %cst_88 [0] : vector<2x128xf32> to vector<128xf32>
    %96 = vector.shape_cast %95 : vector<128xf32> to vector<1x128xf32>
    %97 = tpu.iota {dimensions = array<i32: 0>} : vector<8x128xi32>
    %c0_i32_89 = arith.constant 0 : i32
    %98 = vector.broadcast %c0_i32_89 : i32 to vector<8x128xi32>
    %99 = arith.cmpi eq, %97, %98 : vector<8x128xi32>
    %cst_90 = arith.constant 0.000000e+00 : f32
    %100 = vector.shape_cast %96 : vector<1x128xf32> to vector<1x128xf32>
    %101 = vector.broadcast %100 : vector<1x128xf32> to vector<8x128xf32>
    %102 = vector.broadcast %cst_90 : f32 to vector<8x128xf32>
    %103 = arith.select %99, %101, %102 : vector<8x128xi1>, vector<8x128xf32>
    %104 = arith.addf %6, %103 : vector<8x128xf32>
    %cst_91 = arith.constant dense<0.000000e+00> : vector<128xf32>
    %105 = vector.multi_reduction <add>, %90, %cst_91 [0] : vector<2x128xf32> to vector<128xf32>
    %106 = vector.shape_cast %105 : vector<128xf32> to vector<1x128xf32>
    %107 = tpu.iota {dimensions = array<i32: 0>} : vector<8x128xi32>
    %c0_i32_92 = arith.constant 0 : i32
    %108 = vector.broadcast %c0_i32_92 : i32 to vector<8x128xi32>
    %109 = arith.cmpi eq, %107, %108 : vector<8x128xi32>
    %cst_93 = arith.constant 0.000000e+00 : f32
    %110 = vector.shape_cast %106 : vector<1x128xf32> to vector<1x128xf32>
    %111 = vector.broadcast %110 : vector<1x128xf32> to vector<8x128xf32>
    %112 = vector.broadcast %cst_93 : f32 to vector<8x128xf32>
    %113 = arith.select %109, %111, %112 : vector<8x128xi1>, vector<8x128xf32>
    %114 = arith.addf %14, %113 : vector<8x128xf32>
    %115 = arith.extui %92 : vector<2x128xi1> to vector<2x128xi32>
    %116 = arith.sitofp %115 : vector<2x128xi32> to vector<2x128xf32>
    %cst_94 = arith.constant dense<0.000000e+00> : vector<128xf32>
    %117 = vector.multi_reduction <add>, %116, %cst_94 [0] : vector<2x128xf32> to vector<128xf32>
    %118 = vector.shape_cast %117 : vector<128xf32> to vector<1x128xf32>
    %119 = tpu.iota {dimensions = array<i32: 0>} : vector<8x128xi32>
    %c0_i32_95 = arith.constant 0 : i32
    %120 = vector.broadcast %c0_i32_95 : i32 to vector<8x128xi32>
    %121 = arith.cmpi eq, %119, %120 : vector<8x128xi32>
    %cst_96 = arith.constant 0.000000e+00 : f32
    %122 = vector.shape_cast %118 : vector<1x128xf32> to vector<1x128xf32>
    %123 = vector.broadcast %122 : vector<1x128xf32> to vector<8x128xf32>
    %124 = vector.broadcast %cst_96 : f32 to vector<8x128xf32>
    %125 = arith.select %121, %123, %124 : vector<8x128xi1>, vector<8x128xf32>
    %126 = arith.addf %22, %125 : vector<8x128xf32>
    %127 = arith.mulf %45, %52 : vector<2x128xf32>
    %c2_i32 = arith.constant 2 : i32
    %128 = vector.broadcast %c2_i32 : i32 to vector<2x128xi32>
    %129 = arith.cmpi eq, %28, %128 : vector<2x128xi32>
    %cst_97 = arith.constant 0.000000e+00 : f32
    %130 = vector.broadcast %cst_97 : f32 to vector<2x128xf32>
    %131 = arith.select %129, %127, %130 : vector<2x128xi1>, vector<2x128xf32>
    %cst_98 = arith.constant dense<0.000000e+00> : vector<128xf32>
    %132 = vector.multi_reduction <add>, %131, %cst_98 [0] : vector<2x128xf32> to vector<128xf32>
    %133 = vector.shape_cast %132 : vector<128xf32> to vector<1x128xf32>
    %134 = tpu.iota {dimensions = array<i32: 0>} : vector<8x128xi32>
    %c0_i32_99 = arith.constant 0 : i32
    %135 = vector.broadcast %c0_i32_99 : i32 to vector<8x128xi32>
    %136 = arith.cmpi eq, %134, %135 : vector<8x128xi32>
    %cst_100 = arith.constant 0.000000e+00 : f32
    %137 = vector.shape_cast %133 : vector<1x128xf32> to vector<1x128xf32>
    %138 = vector.broadcast %137 : vector<1x128xf32> to vector<8x128xf32>
    %139 = vector.broadcast %cst_100 : f32 to vector<8x128xf32>
    %140 = arith.select %136, %138, %139 : vector<8x128xi1>, vector<8x128xf32>
    %141 = arith.addf %8, %140 : vector<8x128xf32>
    %cst_101 = arith.constant dense<0.000000e+00> : vector<128xf32>
    %142 = vector.multi_reduction <add>, %127, %cst_101 [0] : vector<2x128xf32> to vector<128xf32>
    %143 = vector.shape_cast %142 : vector<128xf32> to vector<1x128xf32>
    %144 = tpu.iota {dimensions = array<i32: 0>} : vector<8x128xi32>
    %c0_i32_102 = arith.constant 0 : i32
    %145 = vector.broadcast %c0_i32_102 : i32 to vector<8x128xi32>
    %146 = arith.cmpi eq, %144, %145 : vector<8x128xi32>
    %cst_103 = arith.constant 0.000000e+00 : f32
    %147 = vector.shape_cast %143 : vector<1x128xf32> to vector<1x128xf32>
    %148 = vector.broadcast %147 : vector<1x128xf32> to vector<8x128xf32>
    %149 = vector.broadcast %cst_103 : f32 to vector<8x128xf32>
    %150 = arith.select %146, %148, %149 : vector<8x128xi1>, vector<8x128xf32>
    %151 = arith.addf %16, %150 : vector<8x128xf32>
    %152 = arith.extui %129 : vector<2x128xi1> to vector<2x128xi32>
    %153 = arith.sitofp %152 : vector<2x128xi32> to vector<2x128xf32>
    %cst_104 = arith.constant dense<0.000000e+00> : vector<128xf32>
    %154 = vector.multi_reduction <add>, %153, %cst_104 [0] : vector<2x128xf32> to vector<128xf32>
    %155 = vector.shape_cast %154 : vector<128xf32> to vector<1x128xf32>
    %156 = tpu.iota {dimensions = array<i32: 0>} : vector<8x128xi32>
    %c0_i32_105 = arith.constant 0 : i32
    %157 = vector.broadcast %c0_i32_105 : i32 to vector<8x128xi32>
    %158 = arith.cmpi eq, %156, %157 : vector<8x128xi32>
    %cst_106 = arith.constant 0.000000e+00 : f32
    %159 = vector.shape_cast %155 : vector<1x128xf32> to vector<1x128xf32>
    %160 = vector.broadcast %159 : vector<1x128xf32> to vector<8x128xf32>
    %161 = vector.broadcast %cst_106 : f32 to vector<8x128xf32>
    %162 = arith.select %158, %160, %161 : vector<8x128xi1>, vector<8x128xf32>
    %163 = arith.addf %24, %162 : vector<8x128xf32>
    %164 = arith.mulf %47, %52 : vector<2x128xf32>
    %c3_i32 = arith.constant 3 : i32
    %165 = vector.broadcast %c3_i32 : i32 to vector<2x128xi32>
    %166 = arith.cmpi eq, %28, %165 : vector<2x128xi32>
    %cst_107 = arith.constant 0.000000e+00 : f32
    %167 = vector.broadcast %cst_107 : f32 to vector<2x128xf32>
    %168 = arith.select %166, %164, %167 : vector<2x128xi1>, vector<2x128xf32>
    %cst_108 = arith.constant dense<0.000000e+00> : vector<128xf32>
    %169 = vector.multi_reduction <add>, %168, %cst_108 [0] : vector<2x128xf32> to vector<128xf32>
    %170 = vector.shape_cast %169 : vector<128xf32> to vector<1x128xf32>
    %171 = tpu.iota {dimensions = array<i32: 0>} : vector<8x128xi32>
    %c0_i32_109 = arith.constant 0 : i32
    %172 = vector.broadcast %c0_i32_109 : i32 to vector<8x128xi32>
    %173 = arith.cmpi eq, %171, %172 : vector<8x128xi32>
    %cst_110 = arith.constant 0.000000e+00 : f32
    %174 = vector.shape_cast %170 : vector<1x128xf32> to vector<1x128xf32>
    %175 = vector.broadcast %174 : vector<1x128xf32> to vector<8x128xf32>
    %176 = vector.broadcast %cst_110 : f32 to vector<8x128xf32>
    %177 = arith.select %173, %175, %176 : vector<8x128xi1>, vector<8x128xf32>
    %178 = arith.addf %10, %177 : vector<8x128xf32>
    %cst_111 = arith.constant dense<0.000000e+00> : vector<128xf32>
    %179 = vector.multi_reduction <add>, %164, %cst_111 [0] : vector<2x128xf32> to vector<128xf32>
    %180 = vector.shape_cast %179 : vector<128xf32> to vector<1x128xf32>
    %181 = tpu.iota {dimensions = array<i32: 0>} : vector<8x128xi32>
    %c0_i32_112 = arith.constant 0 : i32
    %182 = vector.broadcast %c0_i32_112 : i32 to vector<8x128xi32>
    %183 = arith.cmpi eq, %181, %182 : vector<8x128xi32>
    %cst_113 = arith.constant 0.000000e+00 : f32
    %184 = vector.shape_cast %180 : vector<1x128xf32> to vector<1x128xf32>
    %185 = vector.broadcast %184 : vector<1x128xf32> to vector<8x128xf32>
    %186 = vector.broadcast %cst_113 : f32 to vector<8x128xf32>
    %187 = arith.select %183, %185, %186 : vector<8x128xi1>, vector<8x128xf32>
    %188 = arith.addf %18, %187 : vector<8x128xf32>
    %189 = arith.extui %166 : vector<2x128xi1> to vector<2x128xi32>
    %190 = arith.sitofp %189 : vector<2x128xi32> to vector<2x128xf32>
    %cst_114 = arith.constant dense<0.000000e+00> : vector<128xf32>
    %191 = vector.multi_reduction <add>, %190, %cst_114 [0] : vector<2x128xf32> to vector<128xf32>
    %192 = vector.shape_cast %191 : vector<128xf32> to vector<1x128xf32>
    %193 = tpu.iota {dimensions = array<i32: 0>} : vector<8x128xi32>
    %c0_i32_115 = arith.constant 0 : i32
    %194 = vector.broadcast %c0_i32_115 : i32 to vector<8x128xi32>
    %195 = arith.cmpi eq, %193, %194 : vector<8x128xi32>
    %cst_116 = arith.constant 0.000000e+00 : f32
    %196 = vector.shape_cast %192 : vector<1x128xf32> to vector<1x128xf32>
    %197 = vector.broadcast %196 : vector<1x128xf32> to vector<8x128xf32>
    %198 = vector.broadcast %cst_116 : f32 to vector<8x128xf32>
    %199 = arith.select %195, %197, %198 : vector<8x128xi1>, vector<8x128xf32>
    %200 = arith.addf %26, %199 : vector<8x128xf32>
    %c0_117 = arith.constant 0 : index
    %c0_118 = arith.constant 0 : index
    %c0_119 = arith.constant 0 : index
    %c0_120 = arith.constant 0 : index
    %c0_121 = arith.constant 0 : index
    %201 = vector.load %arg4[%c0_117, %c0_118, %c0_119, %c0_120, %c0_121] : memref<1x3x4x8x128xf32, #tpu.memory_space<vmem>>, vector<1x1x1x8x128xf32>
    %202 = vector.shape_cast %201 : vector<1x1x1x8x128xf32> to vector<8x128xf32>
    %203 = vector.shape_cast %67 : vector<8x128xf32> to vector<1x1x1x8x128xf32>
    tpu.vector_store %arg4[%c0_117, %c0_118, %c0_119, %c0_120, %c0_121], %203 {strides = array<i32>} : memref<1x3x4x8x128xf32, #tpu.memory_space<vmem>>, vector<1x1x1x8x128xf32>,
    %c0_122 = arith.constant 0 : index
    %c0_123 = arith.constant 0 : index
    %c1_124 = arith.constant 1 : index
    %c0_125 = arith.constant 0 : index
    %c0_126 = arith.constant 0 : index
    %204 = vector.load %arg4[%c0_122, %c0_123, %c1_124, %c0_125, %c0_126] : memref<1x3x4x8x128xf32, #tpu.memory_space<vmem>>, vector<1x1x1x8x128xf32>
    %205 = vector.shape_cast %204 : vector<1x1x1x8x128xf32> to vector<8x128xf32>
    %206 = vector.shape_cast %104 : vector<8x128xf32> to vector<1x1x1x8x128xf32>
    tpu.vector_store %arg4[%c0_122, %c0_123, %c1_124, %c0_125, %c0_126], %206 {strides = array<i32>} : memref<1x3x4x8x128xf32, #tpu.memory_space<vmem>>, vector<1x1x1x8x128xf32>,
    %c0_127 = arith.constant 0 : index
    %c0_128 = arith.constant 0 : index
    %c2_129 = arith.constant 2 : index
    %c0_130 = arith.constant 0 : index
    %c0_131 = arith.constant 0 : index
    %207 = vector.load %arg4[%c0_127, %c0_128, %c2_129, %c0_130, %c0_131] : memref<1x3x4x8x128xf32, #tpu.memory_space<vmem>>, vector<1x1x1x8x128xf32>
    %208 = vector.shape_cast %207 : vector<1x1x1x8x128xf32> to vector<8x128xf32>
    %209 = vector.shape_cast %141 : vector<8x128xf32> to vector<1x1x1x8x128xf32>
    tpu.vector_store %arg4[%c0_127, %c0_128, %c2_129, %c0_130, %c0_131], %209 {strides = array<i32>} : memref<1x3x4x8x128xf32, #tpu.memory_space<vmem>>, vector<1x1x1x8x128xf32>,
    %c0_132 = arith.constant 0 : index
    %c0_133 = arith.constant 0 : index
    %c3_134 = arith.constant 3 : index
    %c0_135 = arith.constant 0 : index
    %c0_136 = arith.constant 0 : index
    %210 = vector.load %arg4[%c0_132, %c0_133, %c3_134, %c0_135, %c0_136] : memref<1x3x4x8x128xf32, #tpu.memory_space<vmem>>, vector<1x1x1x8x128xf32>
    %211 = vector.shape_cast %210 : vector<1x1x1x8x128xf32> to vector<8x128xf32>
    %212 = vector.shape_cast %178 : vector<8x128xf32> to vector<1x1x1x8x128xf32>
    tpu.vector_store %arg4[%c0_132, %c0_133, %c3_134, %c0_135, %c0_136], %212 {strides = array<i32>} : memref<1x3x4x8x128xf32, #tpu.memory_space<vmem>>, vector<1x1x1x8x128xf32>,
    %c0_137 = arith.constant 0 : index
    %c1_138 = arith.constant 1 : index
    %c0_139 = arith.constant 0 : index
    %c0_140 = arith.constant 0 : index
    %c0_141 = arith.constant 0 : index
    %213 = vector.load %arg4[%c0_137, %c1_138, %c0_139, %c0_140, %c0_141] : memref<1x3x4x8x128xf32, #tpu.memory_space<vmem>>, vector<1x1x1x8x128xf32>
    %214 = vector.shape_cast %213 : vector<1x1x1x8x128xf32> to vector<8x128xf32>
    %215 = vector.shape_cast %77 : vector<8x128xf32> to vector<1x1x1x8x128xf32>
    tpu.vector_store %arg4[%c0_137, %c1_138, %c0_139, %c0_140, %c0_141], %215 {strides = array<i32>} : memref<1x3x4x8x128xf32, #tpu.memory_space<vmem>>, vector<1x1x1x8x128xf32>,
    %c0_142 = arith.constant 0 : index
    %c1_143 = arith.constant 1 : index
    %c1_144 = arith.constant 1 : index
    %c0_145 = arith.constant 0 : index
    %c0_146 = arith.constant 0 : index
    %216 = vector.load %arg4[%c0_142, %c1_143, %c1_144, %c0_145, %c0_146] : memref<1x3x4x8x128xf32, #tpu.memory_space<vmem>>, vector<1x1x1x8x128xf32>
    %217 = vector.shape_cast %216 : vector<1x1x1x8x128xf32> to vector<8x128xf32>
    %218 = vector.shape_cast %114 : vector<8x128xf32> to vector<1x1x1x8x128xf32>
    tpu.vector_store %arg4[%c0_142, %c1_143, %c1_144, %c0_145, %c0_146], %218 {strides = array<i32>} : memref<1x3x4x8x128xf32, #tpu.memory_space<vmem>>, vector<1x1x1x8x128xf32>,
    %c0_147 = arith.constant 0 : index
    %c1_148 = arith.constant 1 : index
    %c2_149 = arith.constant 2 : index
    %c0_150 = arith.constant 0 : index
    %c0_151 = arith.constant 0 : index
    %219 = vector.load %arg4[%c0_147, %c1_148, %c2_149, %c0_150, %c0_151] : memref<1x3x4x8x128xf32, #tpu.memory_space<vmem>>, vector<1x1x1x8x128xf32>
    %220 = vector.shape_cast %219 : vector<1x1x1x8x128xf32> to vector<8x128xf32>
    %221 = vector.shape_cast %151 : vector<8x128xf32> to vector<1x1x1x8x128xf32>
    tpu.vector_store %arg4[%c0_147, %c1_148, %c2_149, %c0_150, %c0_151], %221 {strides = array<i32>} : memref<1x3x4x8x128xf32, #tpu.memory_space<vmem>>, vector<1x1x1x8x128xf32>,
    %c0_152 = arith.constant 0 : index
    %c1_153 = arith.constant 1 : index
    %c3_154 = arith.constant 3 : index
    %c0_155 = arith.constant 0 : index
    %c0_156 = arith.constant 0 : index
    %222 = vector.load %arg4[%c0_152, %c1_153, %c3_154, %c0_155, %c0_156] : memref<1x3x4x8x128xf32, #tpu.memory_space<vmem>>, vector<1x1x1x8x128xf32>
    %223 = vector.shape_cast %222 : vector<1x1x1x8x128xf32> to vector<8x128xf32>
    %224 = vector.shape_cast %188 : vector<8x128xf32> to vector<1x1x1x8x128xf32>
    tpu.vector_store %arg4[%c0_152, %c1_153, %c3_154, %c0_155, %c0_156], %224 {strides = array<i32>} : memref<1x3x4x8x128xf32, #tpu.memory_space<vmem>>, vector<1x1x1x8x128xf32>,
    %c0_157 = arith.constant 0 : index
    %c2_158 = arith.constant 2 : index
    %c0_159 = arith.constant 0 : index
    %c0_160 = arith.constant 0 : index
    %c0_161 = arith.constant 0 : index
    %225 = vector.load %arg4[%c0_157, %c2_158, %c0_159, %c0_160, %c0_161] : memref<1x3x4x8x128xf32, #tpu.memory_space<vmem>>, vector<1x1x1x8x128xf32>
    %226 = vector.shape_cast %225 : vector<1x1x1x8x128xf32> to vector<8x128xf32>
    %227 = vector.shape_cast %89 : vector<8x128xf32> to vector<1x1x1x8x128xf32>
    tpu.vector_store %arg4[%c0_157, %c2_158, %c0_159, %c0_160, %c0_161], %227 {strides = array<i32>} : memref<1x3x4x8x128xf32, #tpu.memory_space<vmem>>, vector<1x1x1x8x128xf32>,
    %c0_162 = arith.constant 0 : index
    %c2_163 = arith.constant 2 : index
    %c1_164 = arith.constant 1 : index
    %c0_165 = arith.constant 0 : index
    %c0_166 = arith.constant 0 : index
    %228 = vector.load %arg4[%c0_162, %c2_163, %c1_164, %c0_165, %c0_166] : memref<1x3x4x8x128xf32, #tpu.memory_space<vmem>>, vector<1x1x1x8x128xf32>
    %229 = vector.shape_cast %228 : vector<1x1x1x8x128xf32> to vector<8x128xf32>
    %230 = vector.shape_cast %126 : vector<8x128xf32> to vector<1x1x1x8x128xf32>
    tpu.vector_store %arg4[%c0_162, %c2_163, %c1_164, %c0_165, %c0_166], %230 {strides = array<i32>} : memref<1x3x4x8x128xf32, #tpu.memory_space<vmem>>, vector<1x1x1x8x128xf32>,
    %c0_167 = arith.constant 0 : index
    %c2_168 = arith.constant 2 : index
    %c2_169 = arith.constant 2 : index
    %c0_170 = arith.constant 0 : index
    %c0_171 = arith.constant 0 : index
    %231 = vector.load %arg4[%c0_167, %c2_168, %c2_169, %c0_170, %c0_171] : memref<1x3x4x8x128xf32, #tpu.memory_space<vmem>>, vector<1x1x1x8x128xf32>
    %232 = vector.shape_cast %231 : vector<1x1x1x8x128xf32> to vector<8x128xf32>
    %233 = vector.shape_cast %163 : vector<8x128xf32> to vector<1x1x1x8x128xf32>
    tpu.vector_store %arg4[%c0_167, %c2_168, %c2_169, %c0_170, %c0_171], %233 {strides = array<i32>} : memref<1x3x4x8x128xf32, #tpu.memory_space<vmem>>, vector<1x1x1x8x128xf32>,
    %c0_172 = arith.constant 0 : index
    %c2_173 = arith.constant 2 : index
    %c3_174 = arith.constant 3 : index
    %c0_175 = arith.constant 0 : index
    %c0_176 = arith.constant 0 : index
    %234 = vector.load %arg4[%c0_172, %c2_173, %c3_174, %c0_175, %c0_176] : memref<1x3x4x8x128xf32, #tpu.memory_space<vmem>>, vector<1x1x1x8x128xf32>
    %235 = vector.shape_cast %234 : vector<1x1x1x8x128xf32> to vector<8x128xf32>
    %236 = vector.shape_cast %200 : vector<8x128xf32> to vector<1x1x1x8x128xf32>
    tpu.vector_store %arg4[%c0_172, %c2_173, %c3_174, %c0_175, %c0_176], %236 {strides = array<i32>} : memref<1x3x4x8x128xf32, #tpu.memory_space<vmem>>, vector<1x1x1x8x128xf32>,
    return
  }
  func.func @transform_0(%arg0: i32, %arg1: i32) -> (i32, i32, i32, i32) {
    %c0_i32 = arith.constant 0 : i32
    %c0_i32_0 = arith.constant 0 : i32
    %c0_i32_1 = arith.constant 0 : i32
    return %arg0, %c0_i32, %arg1, %c0_i32_0 : i32, i32, i32, i32
  }
  func.func @transform_1(%arg0: i32, %arg1: i32) -> (i32, i32, i32) {
    %c0_i32 = arith.constant 0 : i32
    %c0_i32_0 = arith.constant 0 : i32
    return %arg0, %arg1, %c0_i32 : i32, i32, i32
  }
  func.func @transform_2(%arg0: i32, %arg1: i32) -> (i32, i32, i32, i32, i32) {
    %c0_i32 = arith.constant 0 : i32
    %c0_i32_0 = arith.constant 0 : i32
    %c0_i32_1 = arith.constant 0 : i32
    %c0_i32_2 = arith.constant 0 : i32
    %c0_i32_3 = arith.constant 0 : i32
    return %arg0, %c0_i32, %c0_i32_0, %c0_i32_1, %c0_i32_2 : i32, i32, i32, i32, i32
  }
}

</mosaic_0001>

<bundles_post_ra>
// kernel: tpu_custom_call.1
= control target key start
LH: loop header
LB: loop body
LE: loop exit
PB: predicated region body
PF: predicated region fallthrough
CT: control target
= control target key end

     0   :  { %7 = vsyncpa [#allocation3], 0  ;;  %s1143_s0 = inlined_call_operand.hbm [shape: f32[2,4,2,128], index: 0, kind: input, shape index: {}]   ;;  %s1144_s1 = inlined_call_operand.hbm [shape: s32[2,2,128], index: 1, kind: input, shape index: {}]   ;;  %s1145_s2 = inlined_call_operand.hbm [shape: f32[2,3,4,8,128], index: 2, kind: output, shape index: {}]  }
   0x1   :  { %9 = vsyncpa [#allocation3 + $0x1], 0 }
   0x2   :  { %10 = vsyncpa [#allocation6], 0 }
   0x3   :  { %12 = vsyncpa [#allocation6 + $0x1], 0 }
   0x4   :  { %13 = vsyncpa [#allocation4], 0 }
   0x5   :  { %15 = vsyncpa [#allocation4 + $0x1], 0  ;;  %s849_s9 = smov 0   ;;  %s851_s10 = smov 0  }
   0x6   :  { %s853_s11 = smov 0   ;;  %s855_s12 = smov 0  }
   0x7   :  { %s857_s13 = smov 0   ;;  %s859_s14 = smov 0  }
   0x8 LB: > { %s549_s15 = sadd.s32 4294967295, %s824_s14   ;;  %s550_s16 = sadd.s32 4294967294, %s824_s14   ;;  %s824_s14 = sphi %s859_s14, %s21_s14   ;;  %s820_s13 = sphi %s857_s13, %s1164_s13   ;;  %s816_s12 = sphi %s855_s12, %s1163_s12   ;;  %s812_s11 = sphi %s853_s11, %s1162_s11   ;;  %s808_s10 = sphi %s851_s10, %s1161_s10   ;;  %s804_s9 = sphi %s849_s9, %s1160_s9  }
   0x9   : > { %s33_s17 = sadd.s32 1, %s820_s13  ;;  %s42_s18 = sadd.s32 1, %s812_s11 }
   0xa   : > { %p35_p0 = scmp.ge.s32.totalorder %s33_s17, 2  ;;  %p49_p1 = scmp.ne.s32.totalorder %s812_s11, %s808_s10 }
   0xb   : > { %p50_p2 = scmp.eq.s32.totalorder %s824_s14, 0  ;;  %p55_p3 = scmp.ne.s32.totalorder %s808_s10, %s804_s9 }
   0xc   : > { %s1166_s17 = smov (%p35_p0, %s33_s17), 0  ;;  %p56_p5 = scmp.eq.s32.totalorder %s549_s15, 0 }
   0xd   : > { %p890_p4 = por %p50_p2, %p49_p1  ;;  %s37_s20 = ssub.s32 %s820_s13, %s1166_s17 }
   0xe   : > { %p107_p6 = scmp.eq.s32.totalorder %s549_s15, 1  ;;  %p40_p7 = scmp.eq.s32.totalorder %s37_s20, 0 }
   0xf   : > { %p896_p8 = por %p56_p5, %p55_p3  ;;  %p113_p10 = scmp.eq.s32.totalorder %s550_s16, 1 }
  0x10   : > { %p900_p9 = por %p107_p6, %p49_p1  ;;  %p613_p13 = scmp.lt.s32.totalorder %s824_s14, 2 }
  0x11   : > { %s1149_s21 = scalar_select %p896_p8, 1, 0 }
  0x12   : > { %s1150_s22 = scalar_select %p900_p9, 1, 0 }
  0x13   : > { %s905_s23 = scalar_select %p40_p7, %s812_s11, %s42_s18  }
  0x14   : > { %p907_p11 = por %p113_p10, %p55_p3  ;;  %s914_s25 = sand.u32 1, %s812_s11  }
  0x15   : > { %s553_s26 = sshll.u32 %s914_s25, 3  ;;  %s593_s27 = sshll.u32 %s820_s13, 7 }
  0x16   : > { %s1151_s24 = scalar_select %p907_p11, 1, 0 }
  0x17   : > { %s921_s30 = scalar_lea.hbm %s1143_s0, %s593_s27  ;;  %s137_s3 = scalar_lea.vmem [#allocation2], %s553_s26 }
  0x18   : > { %s145_s4 = sshll.u32 %s137_s3, 4  ;;  %p927_p0 = pnand %p613_p13, %p890_p4  ;;  %s923_s4 = int_to_ptr.vmem [resolvable:$true] %s145_s4 }
  0x19   : > { %s134_s6 = scalar_lea.sflag [#allocation3], %s914_s25  ;;  %s678_s7 = scalar_lea.hbm %s921_s30, 128 }
  0x1a   : > { %p679_p2 = scmp.ne.s32.totalorder %s921_s30, %s678_s7  ;;  %p680_p3 = pneg %p927_p0 }
  0x1b   : > { %s683_s16 = scalar_lea.hbm %s1143_s0, 256  ;;  %p684_p4 = scmp.lt.u32.totalorder %s921_s30, %s1143_s0 }
  0x1c   : > { %p681_p5 = pnand %p680_p3, %p679_p2  ;;  %p685_p7 = scmp.lt.u32.totalorder %s683_s16, %s678_s7 }
  0x1d   : > { %p687_p13 = scmp.lt.u32.totalorder %s678_s7, %s921_s30 }
  0x1e   : > { %p682_p6 = pneg %p681_p5  ;;  %p686_p10 = por %p685_p7, %p684_p4 }
  0x20   : > { %p688_p12 = por %p687_p13, %p686_p10 }
  0x22   : > { %p689_p1 = pnand %p688_p12, %p682_p6 }
  0x24   : > { %692 = shalt.err (!%p689_p1)
}
  0x25   : > { %s693_s20 = scalar_lea.vmem %s923_s4, 128  ;;  %s826_s26 = smov [#allocation2]  }
  0x26   : > { %p694_p2 = scmp.ne.s32.totalorder %s923_s4, %s693_s20  ;;  %s698_s27 = sshll.u32 %s826_s26, 4  ;;  %s699_s27 = int_to_ptr.vmem [resolvable:$false] %s698_s27 }
  0x27   : > { %s700_s28 = scalar_lea.vmem %s699_s27, 256  ;;  %p701_p9 = scmp.lt.s32.totalorder %s923_s4, %s699_s27 }
  0x28   : > { %p696_p5 = pnand %p694_p2, %p680_p3  ;;  %p702_p4 = scmp.lt.s32.totalorder %s700_s28, %s693_s20 }
  0x2a   : > { %p697_p11 = pneg %p696_p5  ;;  %p703_p7 = por %p702_p4, %p701_p9 }
  0x2c   : > { %p704_p10 = pnand %p703_p7, %p697_p11 }
  0x2e   : > { %707 = shalt.err (!%p704_p10)
}
  0x2f   : > { %s827_s29 = smov 32   ;;  %s828_s3 = smov 2  }
  0x30   : > { %605 = dma.hbm_to_vmem [thread:$0]  (!%p927_p0), %s921_s30, 128, %s923_s4, %s134_s6, %s827_s29, %s827_s29, %s828_s3  }
  0x31   : > { %p172_p12 = scmp.lt.s32.totalorder %s824_s14, 3  ;;  %s556_s7 = sshll.u32 %s914_s25, 1 }
  0x32   : > { %s557_s8 = sshll.u32 %s820_s13, 5  ;;  %p1153_p9 = scmp.ge.s32.totalorder %s824_s14, 1 }
  0x33   : > { %s972_s19 = scalar_lea.hbm %s1144_s1, %s557_s8  ;;  %s159_s20 = scalar_lea.vmem [#allocation5], %s556_s7 }
  0x34   : > { %p965_p11 = pnand %p1153_p9, %p172_p12  ;;  %s167_s26 = sshll.u32 %s159_s20, 4  ;;  %s168_s26 = int_to_ptr.vmem [resolvable:$true] %s167_s26 }
  0x35   : > { %s156_s30 = scalar_lea.sflag [#allocation6], %s914_s25  ;;  %s708_s4 = scalar_lea.hbm %s972_s19, 32 }
  0x36   : > { %s1154_s15 = scalar_select %p965_p11, 1, 0 }
  0x37   : > { %p709_p1 = scmp.ne.s32.totalorder %s972_s19, %s708_s4  ;;  %s713_s28 = scalar_lea.hbm %s1144_s1, 64 }
  0x38   : > { %p714_p2 = scmp.lt.u32.totalorder %s972_s19, %s1144_s1  ;;  %p715_p5 = scmp.lt.u32.totalorder %s713_s28, %s708_s4 }
  0x39   : > { %p711_p6 = pnand %p709_p1, %p680_p3  ;;  %p717_p7 = scmp.lt.u32.totalorder %s708_s4, %s972_s19 }
  0x3a   : > { %p716_p4 = por %p715_p5, %p714_p2 }
  0x3b   : > { %p712_p13 = pneg %p711_p6 }
  0x3c   : > { %p718_p10 = por %p717_p7, %p716_p4 }
  0x3e   : > { %p719_p12 = pnand %p718_p10, %p712_p13 }
  0x40   : > { %722 = shalt.err (!%p719_p12)
}
  0x41   : > { %s723_s25 = scalar_lea.vmem %s168_s26, 32  ;;  %s829_s7 = smov [#allocation5]  }
  0x42   : > { %p724_p9 = scmp.ne.s32.totalorder %s168_s26, %s723_s25  ;;  %s728_s8 = sshll.u32 %s829_s7, 4  ;;  %s729_s8 = int_to_ptr.vmem [resolvable:$false] %s728_s8 }
  0x43   : > { %s730_s16 = scalar_lea.vmem %s729_s8, 64  ;;  %p731_p8 = scmp.lt.s32.totalorder %s168_s26, %s729_s8 }
  0x44   : > { %p726_p1 = pnand %p724_p9, %p680_p3  ;;  %p732_p11 = scmp.lt.s32.totalorder %s730_s16, %s723_s25 }
  0x46   : > { %p727_p6 = pneg %p726_p1  ;;  %p733_p2 = por %p732_p11, %p731_p8 }
  0x48   : > { %p734_p5 = pnand %p733_p2, %p727_p6 }
  0x4a   : > { %737 = shalt.err (!%p734_p5)
}
  0x4b   : > { %608 = dma.hbm_to_vmem [thread:$0]  (!%p927_p0), %s972_s19, 32, %s168_s26, %s156_s30  }
  0x4c   : > { %p1155_p13 = scmp.ne.s32.totalorder %s1154_s15, 0 }
  0x4d   : > { %s997_s18 = sand.u32 (!%p1155_p13), 1, %s808_s10   ;;  %p1156_p3 = scmp.ne.s32.totalorder (!%p1155_p13), %s1149_s21, 0 }
  0x4e   : > { %176 = sbr.rel (%p1155_p13) target bundleno = 166 (0xa6), region = 28  ;;  %s559_s20 = sshll.u32 (!%p1155_p13), %s997_s18, 3 }
  0x4f   : > { %s179_s4 = scalar_lea.sflag (!%p1155_p13), [#allocation3], %s997_s18  ;;  %s182_s6 = scalar_lea.vmem (!%p1155_p13), [#allocation2], %s559_s20 }
  0x55   : > { %791 = dma.done.wait (%p1156_p3), %s179_s4, 128  }
  0x56   : > { %793 = vsyncadd (%p1156_p3), %s179_s4, 4294967168  ;;  %s560_s5 = sshll.u32 %s997_s18, 1  ;;  %s188_s15 = scalar_lea.sflag [#allocation6], %s997_s18 }
  0x57   : > { %s191_s19 = scalar_lea.vmem [#allocation5], %s560_s5 }
  0x58   : > { %795 = dma.done.wait (%p1156_p3), %s188_s15, 32  }
  0x59   : > { %797 = vsyncadd (%p1156_p3), %s188_s15, 4294967264  ;;  %vm287_vm0 = vcmask 1041408   ;;  %v1011_v0 = vld [vmem:[%s191_s19] sm:$0x3]  ;;  %v257_v1 = vld [vmem:[%s182_s6] sm:$0x3]  ;;  %v295_v5 = vlaneseq }
  0x5a   : > { %v572_v2 = vld [vmem:[%s182_s6 + $0x2] sm:$0x3]  ;;  %v573_v3 = vld [vmem:[%s182_s6 + $0x4] sm:$0x3]  ;;  %vm285_vm1 = vcmp.eq.s32.totalorder %v1011_v0, 0  ;;  %vm321_vm2 = vcmp.eq.s32.totalorder %v1011_v0, 1 }
  0x5b   : > { %v264_v4 = vmax.f32 %v257_v1, %v572_v2  ;;  %v574_v6 = vld [vmem:[%s182_s6 + $0x6] sm:$0x3]  ;;  %vm353_vm3 = vcmp.eq.s32.totalorder %v1011_v0, 2  ;;  %vm385_vm4 = vcmp.eq.s32.totalorder %v1011_v0, 3  ;;  %v830_v7 = vmov 0.0   ;;  %s594_s21 = smul.u32 96, %s997_s18 }
  0x5c   : > { %v575_v8 = vsel %vm285_vm1, 1.0, %v830_v7  ;;  %v576_v9 = vsel %vm321_vm2, 1.0, %v830_v7  ;;  %v577_v13 = vsel %vm353_vm3, 1.0, %v830_v7  ;;  %v578_v17 = vsel %vm385_vm4, 1.0, %v830_v7  ;;  %s595_s30 = smul.u32 1536, %s816_s12  ;;  %s429_s3 = scalar_lea.sflag [#allocation4], %s997_s18 }
  0x5d   : > { %v265_v10 = vmax.f32 %v264_v4, %v573_v3  ;;  %v311_v11 = vsel %vm287_vm0, %v575_v8, 0.0  ;;  %v343_v12 = vsel %vm287_vm0, %v576_v9, 0.0  ;;  %v375_v16 = vsel %vm287_vm0, %v577_v13, 0.0  ;;  %s1039_s26 = scalar_lea.vmem [#allocation7], %s594_s21  ;;  %p1157_p0 = scmp.ne.s32.totalorder %s1150_s22, 0 }
  0x5e   : > { %v312_v14 = vrot.slane %v311_v11, 4  ;;  %v344_v15 = vrot.slane %v343_v12, 4  ;;  %v376_v19 = vrot.slane %v375_v16, 4  ;;  %v407_v20 = vsel %vm287_vm0, %v578_v17, 0.0  ;;  %s442_s27 = sshll.u32 %s1039_s26, 4  ;;  %s1088_s29 = scalar_lea.hbm %s1145_s2, %s595_s30  ;;  %s1090_s27 = int_to_ptr.vmem [resolvable:$true] %s442_s27 }
  0x5f   : > { %v266_v18 = vmax.f32 %v265_v10, %v574_v6  ;;  %v1029_v21 = vshrl.u32 %v295_v5, 7  ;;  %v408_v24 = vrot.slane %v407_v20, 4  ;;  %s738_s25 = scalar_lea.vmem %s1090_s27, 1536  ;;  %s831_s7 = smov [#allocation7]  }
  0x60   : > { %v313_v22 = vadd.f32 %v312_v14, %v311_v11  ;;  %v345_v23 = vadd.f32 %v344_v15, %v343_v12  ;;  %v377_v31 = vadd.f32 %v376_v19, %v375_v16  ;;  %p739_p8 = scmp.ne.s32.totalorder %s1090_s27, %s738_s25  ;;  %s742_s8 = sshll.u32 %s831_s7, 4  ;;  %s743_s8 = int_to_ptr.vmem [resolvable:$false] %s742_s8 }
  0x61   : > { %v267_v25 = vsub.f32 %v257_v1, %v266_v18  ;;  %v270_v26 = vsub.f32 %v572_v2, %v266_v18  ;;  %v273_v27 = vsub.f32 %v573_v3, %v266_v18  ;;  %v276_v28 = vsub.f32 %v574_v6, %v266_v18  ;;  %s744_s16 = scalar_lea.vmem %s743_s8, 3072  ;;  %p745_p7 = scmp.lt.s32.totalorder %s1090_s27, %s743_s8 }
  0x62   : > { %v314_v29 = vrot.slane %v313_v22, 2  ;;  %v346_v30 = vrot.slane %v345_v23, 2  ;;  %v409_v32 = vadd.f32 %v408_v24, %v407_v20  ;;  %v378_v39 = vrot.slane %v377_v31, 2  ;;  %p740_p11 = pnand %p739_p8, %p1157_p0  ;;  %p746_p10 = scmp.lt.s32.totalorder %s744_s16, %s738_s25 }
  0x63   : > { %v268_v33 = vmul.f32 1.442695, %v267_v25  ;;  %v271_v34 = vmul.f32 1.442695, %v270_v26  ;;  %v274_v35 = vmul.f32 1.442695, %v273_v27 }
  0x64   : > { %v277_v36 = vmul.f32 1.442695, %v276_v28  ;;  %v315_v37 = vadd.f32 %v314_v29, %v313_v22  ;;  %v347_v38 = vadd.f32 %v346_v30, %v345_v23  ;;  %v410_v40 = vrot.slane %v409_v32, 2  ;;  %p741_p4 = pneg %p740_p11  ;;  %p747_p12 = por %p746_p10, %p745_p7 }
  0x65   : > { %668 = vpow2.f32 %v268_v33  ;;  %v379_v43 = vadd.f32 %v378_v39, %v377_v31  ;;  %vm297_vm5 = vcmp.eq.s32.totalorder %v1029_v21, 0 }
  0x66   : > { %670 = vpow2.f32 %v271_v34  ;;  %v316_v41 = vrot.slane %v315_v37, 1  ;;  %v348_v42 = vrot.slane %v347_v38, 1  ;;  %v411_v44 = vadd.f32 %v410_v40, %v409_v32  ;;  %p748_p9 = pnand %p747_p12, %p741_p4 }
  0x67   : > { %672 = vpow2.f32 %v274_v35  ;;  %v380_v47 = vrot.slane %v379_v43, 1 }
  0x68   : > { %674 = vpow2.f32 %v277_v36  ;;  %v317_v45 = vadd.f32 %v316_v41, %v315_v37  ;;  %v349_v46 = vadd.f32 %v348_v42, %v347_v38  ;;  %v412_v48 = vrot.slane %v411_v44, 1 }
  0x69   : > { %v381_v51 = vadd.f32 %v380_v47, %v379_v43 }
  0x6a   : > { %v318_v49 = vsel %vm297_vm5, %v317_v45, 0.0  ;;  %v350_v50 = vsel %vm297_vm5, %v349_v46, 0.0  ;;  %v413_v52 = vadd.f32 %v412_v48, %v411_v44 }
  0x6b   : > { %v382_v53 = vsel %vm297_vm5, %v381_v51, 0.0  ;;  %586 = vst [vmem:[%s1039_s26 + $0x40] sm:$0xff] %v318_v49  ;;  %587 = vst [vmem:[%s1039_s26 + $0x48] sm:$0xff] %v350_v50 }
  0x6c   : > { %v414_v54 = vsel %vm297_vm5, %v413_v52, 0.0  ;;  %588 = vst [vmem:[%s1039_s26 + $0x50] sm:$0xff] %v382_v53 }
  0x6d   : > { %589 = vst [vmem:[%s1039_s26 + $0x58] sm:$0xff] %v414_v54 }
  0x6f   : > { %v669_v55 = vpop.eup %668 }
  0x70   : > { %v671_v56 = vpop.eup %670 }
  0x71   : > { %v673_v57 = vpop.eup %672  ;;  %v279_v58 = vadd.f32 %v671_v56, %v669_v55 }
  0x72   : > { %v675_v59 = vpop.eup %674 }
  0x73   : > { %v280_v60 = vadd.f32 %v673_v57, %v279_v58 }
  0x75   : > { %v281_v61 = vadd.f32 %v675_v59, %v280_v60 }
  0x77   : > { %676 = vrcp.f32 %v281_v61 }
  0x81   : > { %v677_v62 = vpop.eup %676 }
  0x82   : > { %v284_v63 = vmul.f32 %v677_v62, %v669_v55  ;;  %v320_v1 = vmul.f32 %v677_v62, %v671_v56  ;;  %v352_v2 = vmul.f32 %v677_v62, %v673_v57  ;;  %v384_v3 = vmul.f32 %v677_v62, %v675_v59 }
  0x84   : > { %v286_v4 = vsel %vm285_vm1, %v284_v63, 0.0  ;;  %v322_v5 = vsel %vm321_vm2, %v320_v1, 0.0  ;;  %v354_v6 = vsel %vm353_vm3, %v352_v2, 0.0  ;;  %v386_v7 = vsel %vm385_vm4, %v384_v3, 0.0 }
  0x85   : > { %v288_v8 = vsel %vm287_vm0, %v286_v4, 0.0  ;;  %v323_v9 = vsel %vm287_vm0, %v322_v5, 0.0  ;;  %v355_v10 = vsel %vm287_vm0, %v354_v6, 0.0  ;;  %v387_v11 = vsel %vm287_vm0, %v386_v7, 0.0 }
  0x86   : > { %v289_v12 = vrot.slane %v288_v8, 4  ;;  %v324_v13 = vrot.slane %v323_v9, 4  ;;  %v356_v14 = vrot.slane %v355_v10, 4  ;;  %v388_v15 = vrot.slane %v387_v11, 4 }
  0x87   : > { %v300_v16 = vsel %vm287_vm0, %v284_v63, 0.0  ;;  %v332_v17 = vsel %vm287_vm0, %v320_v1, 0.0  ;;  %v364_v18 = vsel %vm287_vm0, %v352_v2, 0.0  ;;  %v396_v0 = vsel %vm287_vm0, %v384_v3, 0.0 }
  0x88   : > { %v290_v19 = vadd.f32 %v289_v12, %v288_v8  ;;  %v325_v20 = vadd.f32 %v324_v13, %v323_v9  ;;  %v357_v22 = vadd.f32 %v356_v14, %v355_v10  ;;  %v389_v23 = vadd.f32 %v388_v15, %v387_v11 }
  0x89   : > { %v301_v24 = vrot.slane %v300_v16, 4  ;;  %v333_v25 = vrot.slane %v332_v17, 4  ;;  %v365_v26 = vrot.slane %v364_v18, 4  ;;  %v397_v27 = vrot.slane %v396_v0, 4 }
  0x8a   : > { %v291_v28 = vrot.slane %v290_v19, 2  ;;  %v326_v29 = vrot.slane %v325_v20, 2  ;;  %v358_v30 = vrot.slane %v357_v22, 2  ;;  %v390_v31 = vrot.slane %v389_v23, 2 }
  0x8b   : > { %v302_v32 = vadd.f32 %v301_v24, %v300_v16  ;;  %v334_v33 = vadd.f32 %v333_v25, %v332_v17  ;;  %v366_v34 = vadd.f32 %v365_v26, %v364_v18  ;;  %v398_v35 = vadd.f32 %v397_v27, %v396_v0 }
  0x8c   : > { %v292_v36 = vadd.f32 %v291_v28, %v290_v19  ;;  %v327_v37 = vadd.f32 %v326_v29, %v325_v20  ;;  %v359_v38 = vadd.f32 %v358_v30, %v357_v22  ;;  %v391_v39 = vadd.f32 %v390_v31, %v389_v23 }
  0x8d   : > { %v303_v40 = vrot.slane %v302_v32, 2  ;;  %v335_v41 = vrot.slane %v334_v33, 2  ;;  %v367_v42 = vrot.slane %v366_v34, 2  ;;  %v399_v43 = vrot.slane %v398_v35, 2 }
  0x8e   : > { %v293_v44 = vrot.slane %v292_v36, 1  ;;  %v328_v45 = vrot.slane %v327_v37, 1  ;;  %v360_v46 = vrot.slane %v359_v38, 1  ;;  %v392_v47 = vrot.slane %v391_v39, 1 }
  0x8f   : > { %v304_v48 = vadd.f32 %v303_v40, %v302_v32  ;;  %v336_v49 = vadd.f32 %v335_v41, %v334_v33  ;;  %v368_v50 = vadd.f32 %v367_v42, %v366_v34  ;;  %v400_v51 = vadd.f32 %v399_v43, %v398_v35 }
  0x90   : > { %v294_v52 = vadd.f32 %v293_v44, %v292_v36  ;;  %v329_v53 = vadd.f32 %v328_v45, %v327_v37  ;;  %v361_v54 = vadd.f32 %v360_v46, %v359_v38  ;;  %v393_v55 = vadd.f32 %v392_v47, %v391_v39 }
  0x91   : > { %v305_v56 = vrot.slane %v304_v48, 1  ;;  %v337_v57 = vrot.slane %v336_v49, 1  ;;  %v369_v58 = vrot.slane %v368_v50, 1  ;;  %v401_v59 = vrot.slane %v400_v51, 1 }
  0x92   : > { %v298_v60 = vsel %vm297_vm5, %v294_v52, 0.0  ;;  %v330_v61 = vsel %vm297_vm5, %v329_v53, 0.0  ;;  %v362_v62 = vsel %vm297_vm5, %v361_v54, 0.0  ;;  %v394_v63 = vsel %vm297_vm5, %v393_v55, 0.0 }
  0x93   : > { %v306_v1 = vadd.f32 %v305_v56, %v304_v48  ;;  %v338_v2 = vadd.f32 %v337_v57, %v336_v49  ;;  %v370_v3 = vadd.f32 %v369_v58, %v368_v50  ;;  %v402_v4 = vadd.f32 %v401_v59, %v400_v51  ;;  %416 = vst [vmem:[%s1039_s26] sm:$0xff] %v298_v60 }
  0x94   : > { %579 = vst [vmem:[%s1039_s26 + $0x8] sm:$0xff] %v330_v61  ;;  %580 = vst [vmem:[%s1039_s26 + $0x10] sm:$0xff] %v362_v62 }
  0x95   : > { %581 = vst [vmem:[%s1039_s26 + $0x18] sm:$0xff] %v394_v63  ;;  %v307_v5 = vsel %vm297_vm5, %v306_v1, 0.0  ;;  %v339_v6 = vsel %vm297_vm5, %v338_v2, 0.0  ;;  %v371_v7 = vsel %vm297_vm5, %v370_v3, 0.0  ;;  %v403_v8 = vsel %vm297_vm5, %v402_v4, 0.0 }
  0x96   : > { %582 = vst [vmem:[%s1039_s26 + $0x20] sm:$0xff] %v307_v5  ;;  %583 = vst [vmem:[%s1039_s26 + $0x28] sm:$0xff] %v339_v6 }
  0x97   : > { %584 = vst [vmem:[%s1039_s26 + $0x30] sm:$0xff] %v371_v7  ;;  %585 = vst [vmem:[%s1039_s26 + $0x38] sm:$0xff] %v403_v8 }
  0x98   : > { %751 = shalt.err (!%p748_p9)
}
  0x99   : > { %s752_s20 = scalar_lea.hbm %s1088_s29, 1536  ;;  %s756_s5 = scalar_lea.hbm %s1145_s2, 3072 }
  0x9a   : > { %p753_p1 = scmp.ne.s32.totalorder %s1088_s29, %s752_s20  ;;  %p757_p5 = scmp.lt.u32.totalorder %s1088_s29, %s1145_s2 }
  0x9b   : > { %p758_p13 = scmp.lt.u32.totalorder %s756_s5, %s752_s20  ;;  %p760_p8 = scmp.lt.u32.totalorder %s752_s20, %s1088_s29 }
  0x9c   : > { %p754_p6 = pnand %p753_p1, %p1157_p0 }
  0x9d   : > { %p759_p3 = por %p758_p13, %p757_p5 }
  0x9e   : > { %p755_p2 = pneg %p754_p6 }
  0x9f   : > { %p761_p11 = por %p760_p8, %p759_p3 }
  0xa1   : > { %p762_p4 = pnand %p761_p11, %p755_p2 }
  0xa3   : > { %765 = shalt.err (!%p762_p4)
}
  0xa4   : > { %s832_s21 = smov 128   ;;  %s833_s26 = smov 8  }
  0xa5   : > { %600 = dma.vmem_to_hbm [thread:$0]  (%p1157_p0), %s1090_s27, 1536, %s1088_s29, %s429_s3, %s832_s21, %s832_s21, %s833_s26  }
  0xa6 PF: > { %s457_s30 = sand.u32 1, %s804_s9   ;;  %p1158_p7 = scmp.ne.s32.totalorder %s1151_s24, 0 }
  0xa7   : > { %p1159_p10 = scmp.ge.s32.totalorder %s824_s14, 2  ;;  %s458_s12 = scalar_lea.sflag [#allocation4], %s457_s30 }
  0xa9   : > { %p610_p12 = pnand %p1159_p10, %p1158_p7 }
  0xab   : > { %799 = dma.done.wait (!%p610_p12), %s458_s12, 1536  }
  0xac   : > { %801 = vsyncadd (!%p610_p12), %s458_s12, 4294965760  ;;  %s21_s14 = sadd.s32 1, %s824_s14   ;;  %s1160_s9 = smov %s808_s10 }
  0xad   : > { %p18_p9 = scmp.ge.s32.totalorder %s21_s14, 4   ;;  %s1161_s10 = smov %s812_s11 }
  0xae   : > { %s1162_s11 = smov %s905_s23  ;;  %s1163_s12 = smov %s820_s13 }
  0xaf   : > { %s1164_s13 = smov %s1166_s17  ;;  %20 = sbr.rel (!%p18_p9) target bundleno = 8 (0x8), region = 104 }
  0xb6   :  { %463 = vsyncpa [#allocation3], 1 }
  0xb7   :  { %465 = vsyncpa [#allocation3 + $0x1], 1 }
  0xb8   :  { %466 = vsyncpa [#allocation6], 1 }
  0xb9   :  { %468 = vsyncpa [#allocation6 + $0x1], 1 }
  0xba   :  { %469 = vsyncpa [#allocation4], 1 }
  0xbb   :  { %471 = vsyncpa [#allocation4 + $0x1], 1 }

</bundles_post_ra>
